<compile_context>
chip_gen: v5e
topology: v5e:2x2
jax: 0.10.0
libtpu: 0.0.40
codegen_flags: <defaults>
</compile_context>

<pallas_src>
from functools import partial

import jax
import jax.numpy as jnp
from jax.experimental import pallas as pl
from jax.experimental.pallas import tpu as pltpu


def _splice_linear_kernel(x_ref, w_ref, b_ref, o_ref, xs_ref):
    # x_ref : (1, h*w, c, rp, pack*p2)  one batch's tokens (free view of x, no copy)
    # w_ref : (w, pack*p2, lanes)       block-diagonal replicated Linear weight
    # b_ref : (1, lanes)                bias tiled `pack` times
    # o_ref : (1, c, rows, lanes)       packed NCHW rows; rows = h*rp, lanes = pack*W
    # xs_ref: (w, c*rows, pack*p2)      VMEM scratch: per-wi M-batched LHS operand
    _, n_tok, c, rp, _ = x_ref.shape
    w = w_ref.shape[0]
    h = n_tok // w
    rows = h * rp

    # Fused rearrange: scatter token row-groups so the dot's M axis equals the
    # output's (channel, packed-row) axis.  All indices are static -> plain copies.
    for hi in range(h):
        for wi in range(w):
            for ch in range(c):
                dst = ch * rows + hi * rp
                xs_ref[wi, dst:dst + rp, :] = x_ref[0, hi * w + wi, ch, :, :]

    # w (=2) MXU dots with M = c*rows (=24), K = pack*p2 (=64), N = lanes (=128),
    # accumulated in f32 (no explicit zero init).
    acc = jnp.dot(xs_ref[0, :, :], w_ref[0, :, :],
                  preferred_element_type=jnp.float32)
    for wi in range(1, w):
        acc = acc + jnp.dot(xs_ref[wi, :, :], w_ref[wi, :, :],
                            preferred_element_type=jnp.float32)
    y = acc + b_ref[...].astype(jnp.float32)              # (c*rows, lanes)

    # Full (8,128)-aligned, unmasked stores: one (rows, lanes) tile per channel.
    for ch in range(c):
        o_ref[0, ch, :, :] = y[ch * rows:(ch + 1) * rows, :].astype(o_ref.dtype)


def _row_pack(img_w, p1):
    """Image rows packed per 128-lane output row (lane-dense stores).
    Falls back to pack=1 (lanes=img_w, possibly masked stores) if img_w does not
    divide 128 — functional but slower; see perf review note for img_size=224."""
    pack = max(1, 128 // img_w) if (128 % img_w == 0) else 1
    while p1 % pack:
        pack //= 2
    return pack


def prepare_splice_params(w_lin, b_lin, *, img_size=32, patch_size=16):
    """One-time (init-time) prep, hoisted out of the hot forward path:
    fold the Linear transpose + row packing into a block-diagonal replicated weight
    w_blk[wi, k*p2+p, k'*W+n] = delta(k,k') * w_lin[n, wi*p2+p], and tile the bias."""
    W = img_size
    p1 = p2 = patch_size
    w = img_size // patch_size
    pack = _row_pack(W, p1)
    lanes = pack * W
    w_r = w_lin.reshape(W, w, p2)                       # [n, wi, p]
    eye = jnp.eye(pack, dtype=w_lin.dtype)
    w_blk = jnp.einsum("rs,nwp->wrpsn", eye, w_r).reshape(w, pack * p2, lanes)
    b_tile = jnp.tile(b_lin, pack).reshape(1, lanes)
    return w_blk, b_tile


def patch_splicing_forward(x, w_blk, b_tile, *, img_size=32, patch_size=16, in_c=3):
    """x: (B, h*w, c*p1*p2) -> (B, C, H, W) with Linear(img_size) on the last axis."""
    B = x.shape[0]
    h = w = img_size // patch_size
    c, p1, p2 = in_c, patch_size, patch_size
    H, W = h * p1, w * p2                    # W == img_size

    pack = _row_pack(W, p1)
    lanes = pack * W                         # 128 for the default config
    rp = p1 // pack
    rows = h * rp                            # H // pack

    # Free (flat-order preserving) view of the token tensor — no transpose, no copy.
    xv = x.reshape(B, h * w, c, rp, pack * p2)

    itemsize = x.dtype.itemsize
    cost = pl.CostEstimate(
        flops=2 * B * c * H * W * W,
        transcendentals=0,
        bytes_accessed=(xv.size * itemsize
                        + w_blk.size * w_blk.dtype.itemsize
                        + b_tile.size * b_tile.dtype.itemsize
                        + B * c * H * W * itemsize),
    )

    out_packed = pl.pallas_call(
        _splice_linear_kernel,
        out_shape=jax.ShapeDtypeStruct((B, c, rows, lanes), x.dtype),
        grid=(B,),
        in_specs=[
            pl.BlockSpec((1, h * w, c, rp, pack * p2),
                         lambda b: (b, 0, 0, 0, 0)),
            pl.BlockSpec((w, pack * p2, lanes), lambda b: (0, 0, 0)),
            pl.BlockSpec((1, lanes), lambda b: (0, 0)),
        ],
        out_specs=pl.BlockSpec((1, c, rows, lanes), lambda b: (b, 0, 0, 0)),
        scratch_shapes=[pltpu.VMEM((w, c * rows, pack * p2), x.dtype)],
        compiler_params=pltpu.CompilerParams(
            dimension_semantics=("parallel",)),
        cost_estimate=cost,
    )(xv, w_blk, b_tile)

    # Free reshape: the packed (rows, pack*W) layout is exactly NCHW row-major.
    return out_packed.reshape(B, c, H, W)


if __name__ == "__main__":
    img_size, patch_size, in_c = 32, 16, 3
    patch = img_size // patch_size                        # 2
    B = 2

    key = jax.random.PRNGKey(0)
    kx, kw, kb = jax.random.split(key, 3)

    # Input tokens: (B, h*w, c*p1*p2) = (2, 4, 768)
    x = jax.random.normal(kx, (B, patch * patch, in_c * patch_size * patch_size),
                          dtype=jnp.float32)

    # nn.Linear(img_size, img_size) params (torch-like uniform init)
    bound = 1.0 / (img_size ** 0.5)
    w_lin = jax.random.uniform(kw, (img_size, img_size), jnp.float32, -bound, bound)
    b_lin = jax.random.uniform(kb, (img_size,), jnp.float32, -bound, bound)

    # One-time weight prep, hoisted out of the hot path (perf-review item 4).
    w_blk, b_tile = prepare_splice_params(w_lin, b_lin,
                                          img_size=img_size, patch_size=patch_size)
    w_blk, b_tile = jax.block_until_ready((w_blk, b_tile))

    fwd = jax.jit(partial(patch_splicing_forward,
                          img_size=img_size, patch_size=patch_size, in_c=in_c))
    y = fwd(x, w_blk, b_tile)
    jax.block_until_ready(y)

    # Reference in plain JAX: rearrange + linear.
    x_img = x.reshape(B, patch, patch, in_c, patch_size, patch_size)
    x_img = jnp.transpose(x_img, (0, 3, 1, 4, 2, 5)).reshape(B, in_c, img_size, img_size)
    y_ref = x_img @ w_lin.T + b_lin

    assert y.shape == (B, in_c, img_size, img_size)
    assert jnp.allclose(y, y_ref, atol=1e-4, rtol=1e-4), \
        float(jnp.max(jnp.abs(y - y_ref)))

    print("KERNEL_OK")
</pallas_src>

<mosaic_0001>
module attributes {stable_mosaic.version = 11 : i64} {
  func.func @_splice_linear_kernel(%arg0: i32, %arg1: memref<1x4x3x4x64xf32, #tpu.memory_space<vmem>>, %arg2: memref<2x64x128xf32, #tpu.memory_space<vmem>>, %arg3: memref<1x128xf32, #tpu.memory_space<vmem>>, %arg4: memref<1x3x8x128xf32, #tpu.memory_space<vmem>>, %arg5: memref<2x24x64xf32, #tpu.memory_space<vmem>>) attributes {dimension_semantics = [#tpu.dimension_semantics<parallel>], iteration_bounds = array<i64: 2>, scalar_prefetch = 0 : i64, scratch_operands = 1 : i64, tpu.core_type = #tpu.core_type<tc>, window_params = [{transform_indices = @transform_0, window_bounds = array<i64: 1, 4, 3, 4, 64>}, {pipeline_mode = #tpu.pipeline_mode<synchronous>, transform_indices = @transform_1, window_bounds = array<i64: 2, 64, 128>}, {pipeline_mode = #tpu.pipeline_mode<synchronous>, transform_indices = @transform_2, window_bounds = array<i64: 1, 128>}, {transform_indices = @transform_3, window_bounds = array<i64: 1, 3, 8, 128>}]} {
    %c0 = arith.constant 0 : index
    %c0_0 = arith.constant 0 : index
    %c0_1 = arith.constant 0 : index
    %c0_2 = arith.constant 0 : index
    %c0_3 = arith.constant 0 : index
    %0 = vector.load %arg1[%c0, %c0_0, %c0_1, %c0_2, %c0_3] : memref<1x4x3x4x64xf32, #tpu.memory_space<vmem>>, vector<1x1x1x4x64xf32>
    %1 = vector.shape_cast %0 : vector<1x1x1x4x64xf32> to vector<4x64xf32>
    %c0_4 = arith.constant 0 : index
    %c0_5 = arith.constant 0 : index
    %c0_6 = arith.constant 0 : index
    %2 = vector.load %arg5[%c0_4, %c0_5, %c0_6] : memref<2x24x64xf32, #tpu.memory_space<vmem>>, vector<1x4x64xf32>
    %3 = vector.shape_cast %2 : vector<1x4x64xf32> to vector<4x64xf32>
    %4 = vector.shape_cast %1 : vector<4x64xf32> to vector<1x4x64xf32>
    tpu.vector_store %arg5[%c0_4, %c0_5, %c0_6], %4 {strides = array<i32>} : memref<2x24x64xf32, #tpu.memory_space<vmem>>, vector<1x4x64xf32>,
    %c0_7 = arith.constant 0 : index
    %c0_8 = arith.constant 0 : index
    %c1 = arith.constant 1 : index
    %c0_9 = arith.constant 0 : index
    %c0_10 = arith.constant 0 : index
    %5 = vector.load %arg1[%c0_7, %c0_8, %c1, %c0_9, %c0_10] : memref<1x4x3x4x64xf32, #tpu.memory_space<vmem>>, vector<1x1x1x4x64xf32>
    %6 = vector.shape_cast %5 : vector<1x1x1x4x64xf32> to vector<4x64xf32>
    %c0_11 = arith.constant 0 : index
    %c8 = arith.constant 8 : index
    %c0_12 = arith.constant 0 : index
    %7 = vector.load %arg5[%c0_11, %c8, %c0_12] : memref<2x24x64xf32, #tpu.memory_space<vmem>>, vector<1x4x64xf32>
    %8 = vector.shape_cast %7 : vector<1x4x64xf32> to vector<4x64xf32>
    %9 = vector.shape_cast %6 : vector<4x64xf32> to vector<1x4x64xf32>
    tpu.vector_store %arg5[%c0_11, %c8, %c0_12], %9 {strides = array<i32>} : memref<2x24x64xf32, #tpu.memory_space<vmem>>, vector<1x4x64xf32>,
    %c0_13 = arith.constant 0 : index
    %c0_14 = arith.constant 0 : index
    %c2 = arith.constant 2 : index
    %c0_15 = arith.constant 0 : index
    %c0_16 = arith.constant 0 : index
    %10 = vector.load %arg1[%c0_13, %c0_14, %c2, %c0_15, %c0_16] : memref<1x4x3x4x64xf32, #tpu.memory_space<vmem>>, vector<1x1x1x4x64xf32>
    %11 = vector.shape_cast %10 : vector<1x1x1x4x64xf32> to vector<4x64xf32>
    %c0_17 = arith.constant 0 : index
    %c16 = arith.constant 16 : index
    %c0_18 = arith.constant 0 : index
    %12 = vector.load %arg5[%c0_17, %c16, %c0_18] : memref<2x24x64xf32, #tpu.memory_space<vmem>>, vector<1x4x64xf32>
    %13 = vector.shape_cast %12 : vector<1x4x64xf32> to vector<4x64xf32>
    %14 = vector.shape_cast %11 : vector<4x64xf32> to vector<1x4x64xf32>
    tpu.vector_store %arg5[%c0_17, %c16, %c0_18], %14 {strides = array<i32>} : memref<2x24x64xf32, #tpu.memory_space<vmem>>, vector<1x4x64xf32>,
    %c0_19 = arith.constant 0 : index
    %c1_20 = arith.constant 1 : index
    %c0_21 = arith.constant 0 : index
    %c0_22 = arith.constant 0 : index
    %c0_23 = arith.constant 0 : index
    %15 = vector.load %arg1[%c0_19, %c1_20, %c0_21, %c0_22, %c0_23] : memref<1x4x3x4x64xf32, #tpu.memory_space<vmem>>, vector<1x1x1x4x64xf32>
    %16 = vector.shape_cast %15 : vector<1x1x1x4x64xf32> to vector<4x64xf32>
    %c1_24 = arith.constant 1 : index
    %c0_25 = arith.constant 0 : index
    %c0_26 = arith.constant 0 : index
    %17 = vector.load %arg5[%c1_24, %c0_25, %c0_26] : memref<2x24x64xf32, #tpu.memory_space<vmem>>, vector<1x4x64xf32>
    %18 = vector.shape_cast %17 : vector<1x4x64xf32> to vector<4x64xf32>
    %19 = vector.shape_cast %16 : vector<4x64xf32> to vector<1x4x64xf32>
    tpu.vector_store %arg5[%c1_24, %c0_25, %c0_26], %19 {strides = array<i32>} : memref<2x24x64xf32, #tpu.memory_space<vmem>>, vector<1x4x64xf32>,
    %c0_27 = arith.constant 0 : index
    %c1_28 = arith.constant 1 : index
    %c1_29 = arith.constant 1 : index
    %c0_30 = arith.constant 0 : index
    %c0_31 = arith.constant 0 : index
    %20 = vector.load %arg1[%c0_27, %c1_28, %c1_29, %c0_30, %c0_31] : memref<1x4x3x4x64xf32, #tpu.memory_space<vmem>>, vector<1x1x1x4x64xf32>
    %21 = vector.shape_cast %20 : vector<1x1x1x4x64xf32> to vector<4x64xf32>
    %c1_32 = arith.constant 1 : index
    %c8_33 = arith.constant 8 : index
    %c0_34 = arith.constant 0 : index
    %22 = vector.load %arg5[%c1_32, %c8_33, %c0_34] : memref<2x24x64xf32, #tpu.memory_space<vmem>>, vector<1x4x64xf32>
    %23 = vector.shape_cast %22 : vector<1x4x64xf32> to vector<4x64xf32>
    %24 = vector.shape_cast %21 : vector<4x64xf32> to vector<1x4x64xf32>
    tpu.vector_store %arg5[%c1_32, %c8_33, %c0_34], %24 {strides = array<i32>} : memref<2x24x64xf32, #tpu.memory_space<vmem>>, vector<1x4x64xf32>,
    %c0_35 = arith.constant 0 : index
    %c1_36 = arith.constant 1 : index
    %c2_37 = arith.constant 2 : index
    %c0_38 = arith.constant 0 : index
    %c0_39 = arith.constant 0 : index
    %25 = vector.load %arg1[%c0_35, %c1_36, %c2_37, %c0_38, %c0_39] : memref<1x4x3x4x64xf32, #tpu.memory_space<vmem>>, vector<1x1x1x4x64xf32>
    %26 = vector.shape_cast %25 : vector<1x1x1x4x64xf32> to vector<4x64xf32>
    %c1_40 = arith.constant 1 : index
    %c16_41 = arith.constant 16 : index
    %c0_42 = arith.constant 0 : index
    %27 = vector.load %arg5[%c1_40, %c16_41, %c0_42] : memref<2x24x64xf32, #tpu.memory_space<vmem>>, vector<1x4x64xf32>
    %28 = vector.shape_cast %27 : vector<1x4x64xf32> to vector<4x64xf32>
    %29 = vector.shape_cast %26 : vector<4x64xf32> to vector<1x4x64xf32>
    tpu.vector_store %arg5[%c1_40, %c16_41, %c0_42], %29 {strides = array<i32>} : memref<2x24x64xf32, #tpu.memory_space<vmem>>, vector<1x4x64xf32>,
    %c0_43 = arith.constant 0 : index
    %c2_44 = arith.constant 2 : index
    %c0_45 = arith.constant 0 : index
    %c0_46 = arith.constant 0 : index
    %c0_47 = arith.constant 0 : index
    %30 = vector.load %arg1[%c0_43, %c2_44, %c0_45, %c0_46, %c0_47] : memref<1x4x3x4x64xf32, #tpu.memory_space<vmem>>, vector<1x1x1x4x64xf32>
    %31 = vector.shape_cast %30 : vector<1x1x1x4x64xf32> to vector<4x64xf32>
    %c0_48 = arith.constant 0 : index
    %c4 = arith.constant 4 : index
    %c0_49 = arith.constant 0 : index
    %32 = vector.load %arg5[%c0_48, %c4, %c0_49] : memref<2x24x64xf32, #tpu.memory_space<vmem>>, vector<1x4x64xf32>
    %33 = vector.shape_cast %32 : vector<1x4x64xf32> to vector<4x64xf32>
    %34 = vector.shape_cast %31 : vector<4x64xf32> to vector<1x4x64xf32>
    tpu.vector_store %arg5[%c0_48, %c4, %c0_49], %34 {strides = array<i32>} : memref<2x24x64xf32, #tpu.memory_space<vmem>>, vector<1x4x64xf32>,
    %c0_50 = arith.constant 0 : index
    %c2_51 = arith.constant 2 : index
    %c1_52 = arith.constant 1 : index
    %c0_53 = arith.constant 0 : index
    %c0_54 = arith.constant 0 : index
    %35 = vector.load %arg1[%c0_50, %c2_51, %c1_52, %c0_53, %c0_54] : memref<1x4x3x4x64xf32, #tpu.memory_space<vmem>>, vector<1x1x1x4x64xf32>
    %36 = vector.shape_cast %35 : vector<1x1x1x4x64xf32> to vector<4x64xf32>
    %c0_55 = arith.constant 0 : index
    %c12 = arith.constant 12 : index
    %c0_56 = arith.constant 0 : index
    %37 = vector.load %arg5[%c0_55, %c12, %c0_56] : memref<2x24x64xf32, #tpu.memory_space<vmem>>, vector<1x4x64xf32>
    %38 = vector.shape_cast %37 : vector<1x4x64xf32> to vector<4x64xf32>
    %39 = vector.shape_cast %36 : vector<4x64xf32> to vector<1x4x64xf32>
    tpu.vector_store %arg5[%c0_55, %c12, %c0_56], %39 {strides = array<i32>} : memref<2x24x64xf32, #tpu.memory_space<vmem>>, vector<1x4x64xf32>,
    %c0_57 = arith.constant 0 : index
    %c2_58 = arith.constant 2 : index
    %c2_59 = arith.constant 2 : index
    %c0_60 = arith.constant 0 : index
    %c0_61 = arith.constant 0 : index
    %40 = vector.load %arg1[%c0_57, %c2_58, %c2_59, %c0_60, %c0_61] : memref<1x4x3x4x64xf32, #tpu.memory_space<vmem>>, vector<1x1x1x4x64xf32>
    %41 = vector.shape_cast %40 : vector<1x1x1x4x64xf32> to vector<4x64xf32>
    %c0_62 = arith.constant 0 : index
    %c20 = arith.constant 20 : index
    %c0_63 = arith.constant 0 : index
    %42 = vector.load %arg5[%c0_62, %c20, %c0_63] : memref<2x24x64xf32, #tpu.memory_space<vmem>>, vector<1x4x64xf32>
    %43 = vector.shape_cast %42 : vector<1x4x64xf32> to vector<4x64xf32>
    %44 = vector.shape_cast %41 : vector<4x64xf32> to vector<1x4x64xf32>
    tpu.vector_store %arg5[%c0_62, %c20, %c0_63], %44 {strides = array<i32>} : memref<2x24x64xf32, #tpu.memory_space<vmem>>, vector<1x4x64xf32>,
    %c0_64 = arith.constant 0 : index
    %c3 = arith.constant 3 : index
    %c0_65 = arith.constant 0 : index
    %c0_66 = arith.constant 0 : index
    %c0_67 = arith.constant 0 : index
    %45 = vector.load %arg1[%c0_64, %c3, %c0_65, %c0_66, %c0_67] : memref<1x4x3x4x64xf32, #tpu.memory_space<vmem>>, vector<1x1x1x4x64xf32>
    %46 = vector.shape_cast %45 : vector<1x1x1x4x64xf32> to vector<4x64xf32>
    %c1_68 = arith.constant 1 : index
    %c4_69 = arith.constant 4 : index
    %c0_70 = arith.constant 0 : index
    %47 = vector.load %arg5[%c1_68, %c4_69, %c0_70] : memref<2x24x64xf32, #tpu.memory_space<vmem>>, vector<1x4x64xf32>
    %48 = vector.shape_cast %47 : vector<1x4x64xf32> to vector<4x64xf32>
    %49 = vector.shape_cast %46 : vector<4x64xf32> to vector<1x4x64xf32>
    tpu.vector_store %arg5[%c1_68, %c4_69, %c0_70], %49 {strides = array<i32>} : memref<2x24x64xf32, #tpu.memory_space<vmem>>, vector<1x4x64xf32>,
    %c0_71 = arith.constant 0 : index
    %c3_72 = arith.constant 3 : index
    %c1_73 = arith.constant 1 : index
    %c0_74 = arith.constant 0 : index
    %c0_75 = arith.constant 0 : index
    %50 = vector.load %arg1[%c0_71, %c3_72, %c1_73, %c0_74, %c0_75] : memref<1x4x3x4x64xf32, #tpu.memory_space<vmem>>, vector<1x1x1x4x64xf32>
    %51 = vector.shape_cast %50 : vector<1x1x1x4x64xf32> to vector<4x64xf32>
    %c1_76 = arith.constant 1 : index
    %c12_77 = arith.constant 12 : index
    %c0_78 = arith.constant 0 : index
    %52 = vector.load %arg5[%c1_76, %c12_77, %c0_78] : memref<2x24x64xf32, #tpu.memory_space<vmem>>, vector<1x4x64xf32>
    %53 = vector.shape_cast %52 : vector<1x4x64xf32> to vector<4x64xf32>
    %54 = vector.shape_cast %51 : vector<4x64xf32> to vector<1x4x64xf32>
    tpu.vector_store %arg5[%c1_76, %c12_77, %c0_78], %54 {strides = array<i32>} : memref<2x24x64xf32, #tpu.memory_space<vmem>>, vector<1x4x64xf32>,
    %c0_79 = arith.constant 0 : index
    %c3_80 = arith.constant 3 : index
    %c2_81 = arith.constant 2 : index
    %c0_82 = arith.constant 0 : index
    %c0_83 = arith.constant 0 : index
    %55 = vector.load %arg1[%c0_79, %c3_80, %c2_81, %c0_82, %c0_83] : memref<1x4x3x4x64xf32, #tpu.memory_space<vmem>>, vector<1x1x1x4x64xf32>
    %56 = vector.shape_cast %55 : vector<1x1x1x4x64xf32> to vector<4x64xf32>
    %c1_84 = arith.constant 1 : index
    %c20_85 = arith.constant 20 : index
    %c0_86 = arith.constant 0 : index
    %57 = vector.load %arg5[%c1_84, %c20_85, %c0_86] : memref<2x24x64xf32, #tpu.memory_space<vmem>>, vector<1x4x64xf32>
    %58 = vector.shape_cast %57 : vector<1x4x64xf32> to vector<4x64xf32>
    %59 = vector.shape_cast %56 : vector<4x64xf32> to vector<1x4x64xf32>
    tpu.vector_store %arg5[%c1_84, %c20_85, %c0_86], %59 {strides = array<i32>} : memref<2x24x64xf32, #tpu.memory_space<vmem>>, vector<1x4x64xf32>,
    %c0_87 = arith.constant 0 : index
    %c0_88 = arith.constant 0 : index
    %c0_89 = arith.constant 0 : index
    %60 = vector.load %arg5[%c0_87, %c0_88, %c0_89] : memref<2x24x64xf32, #tpu.memory_space<vmem>>, vector<1x24x64xf32>
    %61 = vector.shape_cast %60 : vector<1x24x64xf32> to vector<24x64xf32>
    %c0_90 = arith.constant 0 : index
    %c0_91 = arith.constant 0 : index
    %c0_92 = arith.constant 0 : index
    %62 = vector.load %arg2[%c0_90, %c0_91, %c0_92] : memref<2x64x128xf32, #tpu.memory_space<vmem>>, vector<1x64x128xf32>
    %63 = vector.shape_cast %62 : vector<1x64x128xf32> to vector<64x128xf32>
    %cst = arith.constant dense<0.000000e+00> : vector<24x128xf32>
    %64 = tpu.matmul %61, %63, %cst {dimension_numbers = #tpu.dot_dimension_numbers<[1], [0], [0], [1], [0, 0, 1, 1], [], []>} : vector<24x64xf32>, vector<64x128xf32>, vector<24x128xf32> -> vector<24x128xf32>
    %c1_93 = arith.constant 1 : index
    %c0_94 = arith.constant 0 : index
    %c0_95 = arith.constant 0 : index
    %65 = vector.load %arg5[%c1_93, %c0_94, %c0_95] : memref<2x24x64xf32, #tpu.memory_space<vmem>>, vector<1x24x64xf32>
    %66 = vector.shape_cast %65 : vector<1x24x64xf32> to vector<24x64xf32>
    %c1_96 = arith.constant 1 : index
    %c0_97 = arith.constant 0 : index
    %c0_98 = arith.constant 0 : index
    %67 = vector.load %arg2[%c1_96, %c0_97, %c0_98] : memref<2x64x128xf32, #tpu.memory_space<vmem>>, vector<1x64x128xf32>
    %68 = vector.shape_cast %67 : vector<1x64x128xf32> to vector<64x128xf32>
    %cst_99 = arith.constant dense<0.000000e+00> : vector<24x128xf32>
    %69 = tpu.matmul %66, %68, %cst_99 {dimension_numbers = #tpu.dot_dimension_numbers<[1], [0], [0], [1], [0, 0, 1, 1], [], []>} : vector<24x64xf32>, vector<64x128xf32>, vector<24x128xf32> -> vector<24x128xf32>
    %70 = arith.addf %64, %69 : vector<24x128xf32>
    %c0_100 = arith.constant 0 : index
    %c0_101 = arith.constant 0 : index
    %71 = vector.load %arg3[%c0_100, %c0_101] : memref<1x128xf32, #tpu.memory_space<vmem>>, vector<1x128xf32>
    %72 = vector.broadcast %71 : vector<1x128xf32> to vector<24x128xf32>
    %73 = arith.addf %70, %72 : vector<24x128xf32>
    %74 = vector.extract_strided_slice %73 {offsets = [0, 0], sizes = [8, 128], strides = [1, 1]} : vector<24x128xf32> to vector<8x128xf32>
    %c0_102 = arith.constant 0 : index
    %c0_103 = arith.constant 0 : index
    %c0_104 = arith.constant 0 : index
    %c0_105 = arith.constant 0 : index
    %75 = vector.load %arg4[%c0_102, %c0_103, %c0_104, %c0_105] : memref<1x3x8x128xf32, #tpu.memory_space<vmem>>, vector<1x1x8x128xf32>
    %76 = vector.shape_cast %75 : vector<1x1x8x128xf32> to vector<8x128xf32>
    %77 = vector.shape_cast %74 : vector<8x128xf32> to vector<1x1x8x128xf32>
    tpu.vector_store %arg4[%c0_102, %c0_103, %c0_104, %c0_105], %77 {strides = array<i32>} : memref<1x3x8x128xf32, #tpu.memory_space<vmem>>, vector<1x1x8x128xf32>,
    %78 = vector.extract_strided_slice %73 {offsets = [8, 0], sizes = [8, 128], strides = [1, 1]} : vector<24x128xf32> to vector<8x128xf32>
    %c0_106 = arith.constant 0 : index
    %c1_107 = arith.constant 1 : index
    %c0_108 = arith.constant 0 : index
    %c0_109 = arith.constant 0 : index
    %79 = vector.load %arg4[%c0_106, %c1_107, %c0_108, %c0_109] : memref<1x3x8x128xf32, #tpu.memory_space<vmem>>, vector<1x1x8x128xf32>
    %80 = vector.shape_cast %79 : vector<1x1x8x128xf32> to vector<8x128xf32>
    %81 = vector.shape_cast %78 : vector<8x128xf32> to vector<1x1x8x128xf32>
    tpu.vector_store %arg4[%c0_106, %c1_107, %c0_108, %c0_109], %81 {strides = array<i32>} : memref<1x3x8x128xf32, #tpu.memory_space<vmem>>, vector<1x1x8x128xf32>,
    %82 = vector.extract_strided_slice %73 {offsets = [16, 0], sizes = [8, 128], strides = [1, 1]} : vector<24x128xf32> to vector<8x128xf32>
    %c0_110 = arith.constant 0 : index
    %c2_111 = arith.constant 2 : index
    %c0_112 = arith.constant 0 : index
    %c0_113 = arith.constant 0 : index
    %83 = vector.load %arg4[%c0_110, %c2_111, %c0_112, %c0_113] : memref<1x3x8x128xf32, #tpu.memory_space<vmem>>, vector<1x1x8x128xf32>
    %84 = vector.shape_cast %83 : vector<1x1x8x128xf32> to vector<8x128xf32>
    %85 = vector.shape_cast %82 : vector<8x128xf32> to vector<1x1x8x128xf32>
    tpu.vector_store %arg4[%c0_110, %c2_111, %c0_112, %c0_113], %85 {strides = array<i32>} : memref<1x3x8x128xf32, #tpu.memory_space<vmem>>, vector<1x1x8x128xf32>,
    return
  }
  func.func @transform_0(%arg0: i32) -> (i32, i32, i32, i32, i32) {
    %c0_i32 = arith.constant 0 : i32
    %c0_i32_0 = arith.constant 0 : i32
    %c0_i32_1 = arith.constant 0 : i32
    %c0_i32_2 = arith.constant 0 : i32
    %c0_i32_3 = arith.constant 0 : i32
    return %arg0, %c0_i32, %c0_i32_0, %c0_i32_1, %c0_i32_2 : i32, i32, i32, i32, i32
  }
  func.func @transform_1(%arg0: i32) -> (i32, i32, i32) {
    %c0_i32 = arith.constant 0 : i32
    %c0_i32_0 = arith.constant 0 : i32
    %c0_i32_1 = arith.constant 0 : i32
    %c0_i32_2 = arith.constant 0 : i32
    return %c0_i32, %c0_i32_0, %c0_i32_1 : i32, i32, i32
  }
  func.func @transform_2(%arg0: i32) -> (i32, i32) {
    %c0_i32 = arith.constant 0 : i32
    %c0_i32_0 = arith.constant 0 : i32
    %c0_i32_1 = arith.constant 0 : i32
    return %c0_i32, %c0_i32_0 : i32, i32
  }
  func.func @transform_3(%arg0: i32) -> (i32, i32, i32, i32) {
    %c0_i32 = arith.constant 0 : i32
    %c0_i32_0 = arith.constant 0 : i32
    %c0_i32_1 = arith.constant 0 : i32
    %c0_i32_2 = arith.constant 0 : i32
    return %arg0, %c0_i32, %c0_i32_0, %c0_i32_1 : i32, i32, i32, i32
  }
}

</mosaic_0001>

<bundles_post_ra>
// kernel: patch_splicing_forward.1
= control target key start
LH: loop header
LB: loop body
LE: loop exit
PB: predicated region body
PF: predicated region fallthrough
CT: control target
= control target key end

     0   :  { %s460_s12 = smov 0   ;;  %s564_s0 = inlined_call_operand.vmem [shape: f32[2,4,3,4,64], index: 0, kind: input, shape index: {}]   ;;  %s565_s1 = inlined_call_operand.vmem [shape: f32[2,64,128], index: 1, kind: input, shape index: {}]   ;;  %s566_s2 = inlined_call_operand.vmem [shape: f32[1,128], index: 2, kind: input, shape index: {}]   ;;  %s567_s3 = inlined_call_operand.vmem [shape: f32[2,3,8,128], index: 3, kind: output, shape index: {}]  }
   0x1 LB: > { %s369_s13 = sadd.s32 4294967295, %s438_s12   ;;  %p373_p0 = scmp.ge.s32.totalorder %s438_s12, 1  ;;  %s438_s12 = sphi %s460_s12, %s13_s12  }
   0x2   : > { %p137_p1 = scmp.lt.s32.totalorder %s438_s12, 3 }
   0x4   : > { %p138_p2 = pnand %p373_p0, %p137_p1 }
   0x5   : > { %p161_p3 = scmp.lt.s32.totalorder (!%p138_p2), %s369_s13, 1 }
   0x6   : > { %141 = sbr.rel (%p138_p2) target bundleno = 173 (0xad), region = 32 }
   0xb   : > { %v394_v0 = vld [vmem:[%s565_s1 + $0x78] sm:$0xff]  ;;  %v393_v2 = vld [vmem:[%s565_s1 + $0x70] sm:$0xff]  ;;  %v392_v4 = vld [vmem:[%s565_s1 + $0x68] sm:$0xff]  ;;  %s569_s13 = smov (!%p161_p3, %s369_s13), 1  ;;  %vm172_vm0 = vcmask 519168   ;;  %vm231_vm1 = vcmask 523264  }
   0xc   : > { %v218_v1 = vld [vmem:[%s565_s1 + $0x38] sm:$0xff]  ;;  %405 = vmatpush.msra.mxu2 %v394_v0  ;;  %v217_v3 = vld [vmem:[%s565_s1 + $0x30] sm:$0xff]  ;;  %v216_v5 = vld [vmem:[%s565_s1 + $0x28] sm:$0xff]  ;;  %249 = vmatpush.msra.mxu0 %v394_v0  ;;  %s421_s30 = smul.u32 48, %s569_s13 }
   0xd   : > { %413 = vmatpush.msra.mxu3 %v218_v1  ;;  %284 = vmatpush.msra.mxu1 %v218_v1  ;;  %v391_v6 = vld [vmem:[%s565_s1 + $0x60] sm:$0xff]  ;;  %v390_v8 = vld [vmem:[%s565_s1 + $0x58] sm:$0xff]  ;;  %v389_v13 = vld [vmem:[%s565_s1 + $0x50] sm:$0xff]  ;;  %s422_s25 = smul.u32 24, %s569_s13 }
   0xe   : > { %406 = vmatpush.msra.mxu2 %v393_v2  ;;  %v215_v7 = vld [vmem:[%s565_s1 + $0x20] sm:$0xff]  ;;  %250 = vmatpush.msra.mxu0 %v393_v2  ;;  %v214_v9 = vld [vmem:[%s565_s1 + $0x18] sm:$0xff]  ;;  %s504_s10 = scalar_lea.vmem %s564_s0, %s421_s30  ;;  %v213_v14 = vld [vmem:[%s565_s1 + $0x10] sm:$0xff] }
   0xf   : > { %414 = vmatpush.msra.mxu3 %v217_v3  ;;  %285 = vmatpush.msra.mxu1 %v217_v3  ;;  %v379_v10 = vld [vmem:[%s504_s10 + $0x10] sm:$0xf]  ;;  %v385_v11 = vld [vmem:[%s504_s10 + $0x28] sm:$0xf]  ;;  %v376_v12 = vld [vmem:[%s504_s10 + $0x4] sm:$0xf]  ;;  %s170_s30 = scalar_lea.vmem %s567_s3, %s422_s25 }
  0x10   : > { %407 = vmatpush.msra.mxu2 %v392_v4  ;;  %251 = vmatpush.msra.mxu0 %v392_v4  ;;  %186 = vst.msk [vmem:[#allocation2 + $0x20] sm:$0xf] %vm172_vm0, %v379_v10  ;;  %v382_v15 = vld [vmem:[%s504_s10 + $0x1c] sm:$0xf]  ;;  %v380_v16 = vld [vmem:[%s504_s10 + $0x14] sm:$0xf] }
  0x11   : > { %415 = vmatpush.msra.mxu3 %v216_v5  ;;  %286 = vmatpush.msra.mxu1 %v216_v5  ;;  %204 = vst.msk [vmem:[#allocation2 + $0x24] sm:$0xf] %vm172_vm0, %v385_v11  ;;  %v388_v17 = vld [vmem:[%s565_s1 + $0x48] sm:$0xff]  ;;  %v387_v21 = vld [vmem:[%s565_s1 + $0x40] sm:$0xff]  ;;  %v381_v28 = vld [vmem:[%s504_s10 + $0x18] sm:$0xf] }
  0x12   : > { %408 = vmatpush.msra.mxu2 %v391_v6  ;;  %252 = vmatpush.msra.mxu0 %v391_v6  ;;  %v212_v18 = vld [vmem:[%s565_s1 + $0x8] sm:$0xff]  ;;  %176 = vst.msk [vmem:[#allocation2 + $0x8] sm:$0xf] %vm172_vm0, %v376_v12  ;;  %v211_v22 = vld [vmem:[%s565_s1] sm:$0xff] }
  0x13   : > { %416 = vmatpush.msra.mxu3 %v215_v7  ;;  %287 = vmatpush.msra.mxu1 %v215_v7  ;;  %v386_v19 = vld [vmem:[%s504_s10 + $0x2c] sm:$0xf]  ;;  %195 = vst.msk [vmem:[#allocation2 + $0xc] sm:$0xf] %vm172_vm0, %v382_v15  ;;  %v377_v20 = vld [vmem:[%s504_s10 + $0x8] sm:$0xf] }
  0x14   : > { %409 = vmatpush.msra.mxu2 %v390_v8  ;;  %253 = vmatpush.msra.mxu0 %v390_v8  ;;  %189 = vst.msk [vmem:[#allocation2 + $0x28] sm:$0xf] %vm172_vm0, %v380_v16  ;;  %v383_v23 = vld [vmem:[%s504_s10 + $0x20] sm:$0xf]  ;;  %v378_v24 = vld [vmem:[%s504_s10 + $0xc] sm:$0xf] }
  0x15   : > { %417 = vmatpush.msra.mxu3 %v214_v9  ;;  %288 = vmatpush.msra.mxu1 %v214_v9  ;;  %207 = vst.msk [vmem:[#allocation2 + $0x2c] sm:$0xf] %vm172_vm0, %v386_v19  ;;  %v384_v25 = vld [vmem:[%s504_s10 + $0x24] sm:$0xf]  ;;  %v171_v26 = vld [vmem:[%s504_s10] sm:$0xf] }
  0x16   : > { %410 = vmatpush.msra.mxu2 %v389_v13  ;;  %254 = vmatpush.msra.mxu0 %v389_v13  ;;  %179 = vst.msk [vmem:[#allocation2 + $0x10] sm:$0xf] %vm172_vm0, %v377_v20  ;;  %v431_v35 = vld [vmem:[%s566_s2] ss:$0 sm:$0xff] }
  0x17   : > { %418 = vmatpush.msra.mxu3 %v213_v14  ;;  %289 = vmatpush.msra.mxu1 %v213_v14  ;;  %198 = vst.msk [vmem:[#allocation2 + $0x14] sm:$0xf] %vm172_vm0, %v383_v23 }
  0x18   : > { %411 = vmatpush.msra.mxu2 %v388_v17  ;;  %255 = vmatpush.msra.mxu0 %v388_v17  ;;  %v220_v27 = vld [vmem:[#allocation2 + $0x20] sm:$0xff]  ;;  %183 = vst.msk [vmem:[#allocation2 + $0x18] sm:$0xf] %vm172_vm0, %v378_v24 }
  0x19   : > { %419 = vmatpush.msra.mxu3 %v212_v18  ;;  %290 = vmatpush.msra.mxu1 %v212_v18  ;;  %201 = vst.msk [vmem:[#allocation2 + $0x1c] sm:$0xf] %vm172_vm0, %v384_v25 }
  0x1a   : > { %412 = vmatpush.msra.mxu2 %v387_v21  ;;  %256 = vmatpush.msra.mxu0 %v387_v21  ;;  %v209_v29 = vld [vmem:[#allocation2 + $0x8] sm:$0xff]  ;;  %173 = vst.msk [vmem:[#allocation2] sm:$0xf] %vm172_vm0, %v171_v26 }
  0x1b   : > { %420 = vmatpush.msra.mxu3 %v211_v22  ;;  %291 = vmatpush.msra.mxu1 %v211_v22  ;;  %192 = vst.msk [vmem:[#allocation2 + $0x4] sm:$0xf] %vm172_vm0, %v381_v28 }
  0x1c   : > { %396 = vmatmul.msk.f32.vlgmr.msra.gmra.mxu2 %vm231_vm1, %v220_v27  ;;  %399 = vmatmul.msk.f32.vlgmr.msra.gmra.mxu3 %vm231_vm1, %v209_v29  ;;  %v221_v30 = vld [vmem:[#allocation2 + $0x28] sm:$0xff] }
  0x1e   : > { %v210_v31 = vld [vmem:[#allocation2 + $0x10] sm:$0xff] }
  0x20   : > { %v219_v32 = vld [vmem:[#allocation2 + $0x18] sm:$0xff] }
  0x21   : > { %395 = vmatmul.msk.f32.vlgmr.msra.gmra.mxu0 %vm231_vm1, %v219_v32 }
  0x22   : > { %v208_v33 = vld [vmem:[#allocation2] sm:$0xff] }
  0x23   : > { %398 = vmatmul.msk.f32.vlgmr.msra.gmra.mxu1 %vm231_vm1, %v208_v33 }
  0x24   : > { %397 = vmatmul.msk.f32.gmra.mxu2 %vm231_vm1, %v221_v30  ;;  %400 = vmatmul.msk.f32.gmra.mxu3 %vm231_vm1, %v210_v31 }
  0x9e   : > { %v258_v37 = vpop.f32.mrf.mxu0 }
  0x9f   : > { %v261_v34 = vpop.f32.mrf.mxu2  ;;  %v296_v36 = vpop.f32.mrf.mxu3 }
  0xa0   : > { %v297_v38 = vadd.f32 %v296_v36, %v261_v34  ;;  %v293_v39 = vpop.f32.mrf.mxu1 }
  0xa1   : > { %v294_v41 = vadd.f32 %v293_v39, %v258_v37 }
  0xa2   : > { %v307_v40 = vadd.f32 %v431_v35, %v297_v38 }
  0xa3   : > { %v306_v42 = vadd.f32 %v431_v35, %v294_v41 }
  0xa4   : > { %401 = vst [vmem:[%s170_s30 + $0x8] sm:$0xff] %v307_v40 }
  0xa5   : > { %309 = vst [vmem:[%s170_s30] sm:$0xff] %v306_v42 }
  0xa7   : > { %v264_v43 = vpop.f32.mrf.mxu2  ;;  %v299_v44 = vpop.f32.mrf.mxu3 }
  0xa8   : > { %v300_v45 = vadd.f32 %v299_v44, %v264_v43 }
  0xaa   : > { %v308_v46 = vadd.f32 %v431_v35, %v300_v45 }
  0xac   : > { %402 = vst [vmem:[%s170_s30 + $0x10] sm:$0xff] %v308_v46 }
  0xad PF: > { %s13_s12 = sadd.s32 1, %s438_s12  }
  0xae   : > { %p10_p4 = scmp.ge.s32.totalorder %s13_s12, 4  }
  0xb0   :  { %12 = sbr.rel (!%p10_p4) target bundleno = 1 (0x1), region = 77 }

</bundles_post_ra>
